<compile_context>
chip_gen: v5e
topology: v5e:2x2
jax: 0.10.0
libtpu: 0.0.40
codegen_flags: <defaults>
</compile_context>

<pallas_src>
import functools

import jax
import jax.numpy as jnp
from jax.experimental import pallas as pl
from jax.experimental.pallas import tpu as pltpu


def _round_up(x, m):
    return (x + m - 1) // m * m


def _stainnet_kernel(x_ref, w1_ref, b1_ref, w2_ref, b2_ref, w3t_ref, b3_ref,
                     o_ref):
    # Shapes (batch dim squeezed by the BlockSpec):
    #   x_ref:   (C_in,  T)              input pixel tile (lane-dense)
    #   w1_ref:  (n_ch, C_in)  f32       b1_ref: (n_ch, 1)  f32
    #   w2_ref:  (n_ch, n_ch)  bf16      b2_ref: (n_ch, 1)  f32
    #   w3t_ref: (n_ch, C_out) f32       b3_ref: (C_out, 1) f32
    #   o_ref:   (C_out, T)
    x = x_ref[...].astype(jnp.float32)             # f32 math even for bf16 in

    # ---- layer 1: C_in (=3) -> n_ch, broadcast FMAs on the VPU (f32) ----
    w1 = w1_ref[...].astype(jnp.float32)           # (n_ch, C_in)
    c_in = w1.shape[1]
    h = w1[:, 0:1] * x[0:1, :]                     # (n_ch, T)
    for c in range(1, c_in):                       # tiny, static trip count
        h = h + w1[:, c:c + 1] * x[c:c + 1, :]
    h = jnp.maximum(h + b1_ref[...], 0.0)          # bias + ReLU, f32

    # ---- layer 2: n_ch -> n_ch on the MXU, bf16 operands, f32 accum ----
    h = jnp.dot(w2_ref[...], h.astype(jnp.bfloat16),
                preferred_element_type=jnp.float32)
    h = jnp.maximum(h + b2_ref[...], 0.0)          # bias + ReLU, f32

    # ---- layer 3: n_ch -> C_out (=3) OFF the MXU: sublane reductions ----
    # o[c, :] = sum_k w3[c, k] * h[k, :]   (VPU multiply + XLU reduce)
    w3t = w3t_ref[...].astype(jnp.float32)         # (n_ch, C_out)
    rows = []
    for c in range(w3t.shape[1]):                  # tiny, static trip count
        rows.append(jnp.sum(w3t[:, c:c + 1] * h, axis=0, keepdims=True))
    o = jnp.concatenate(rows, axis=0) + b3_ref[...]

    o_ref[...] = o.astype(o_ref.dtype)             # (C_out, T), lane-dense


def stainnet_forward(x_nchw, params, *, tile_pixels=16384,
                     vmem_limit_bytes=None):
    """Forward pass matching PyTorch StainNet (kernel_size=1, n_layer=3).

    x_nchw: (N, C_in, H, W), f32 or bf16.
    params: w1 (n_ch, C_in), b1 (n_ch, 1), w2 (n_ch, n_ch), b2 (n_ch, 1),
            w3 (C_out, n_ch), b3 (C_out, 1)   [PyTorch Conv2d orientation].
    Returns (N, C_out, H, W) in x_nchw.dtype.
    """
    N, C_in, H, W = x_nchw.shape
    n_ch = params["w1"].shape[0]
    C_out = params["w3"].shape[0]
    HW = H * W

    # Pixel tile: lane-dense (multiple of 128) unless the whole image fits in
    # one lane group.  Ragged last tiles are handled by Pallas partial-block
    # masking (per-pixel math => padding can't contaminate valid outputs), so
    # there is NO wrapper-side pad / slice HBM pass.
    t_req = max(128, (max(tile_pixels, 128) // 128) * 128)
    if HW % 128 == 0:
        T = min(t_req, HW)
    elif HW < 128:
        T = HW                                     # block == full array dim
    else:
        T = min(t_req, _round_up(HW, 128))
    grid = (N, pl.cdiv(HW, T))

    # NCHW -> (N, C, H*W): pure reshape, no transpose, no extra HBM pass.
    x_pix = x_nchw.reshape(N, C_in, HW)

    w2_bf16 = params["w2"].astype(jnp.bfloat16)    # bf16 MXU operand
    w3_t = params["w3"].T                          # (n_ch, C_out): 96 elems

    wfull = lambda n, p: (0, 0)                    # weights resident in VMEM

    compiler_kwargs = dict(dimension_semantics=("parallel", "parallel"))
    if vmem_limit_bytes is not None:
        compiler_kwargs["vmem_limit_bytes"] = vmem_limit_bytes

    out_pix = pl.pallas_call(
        _stainnet_kernel,
        out_shape=jax.ShapeDtypeStruct((N, C_out, HW), x_nchw.dtype),
        grid_spec=pltpu.PrefetchScalarGridSpec(
            num_scalar_prefetch=0,
            grid=grid,
            in_specs=[
                pl.BlockSpec((None, C_in, T), lambda n, p: (n, 0, p)),
                pl.BlockSpec((n_ch, C_in), wfull),
                pl.BlockSpec((n_ch, 1), wfull),
                pl.BlockSpec((n_ch, n_ch), wfull),
                pl.BlockSpec((n_ch, 1), wfull),
                pl.BlockSpec((n_ch, C_out), wfull),
                pl.BlockSpec((C_out, 1), wfull),
            ],
            out_specs=pl.BlockSpec((None, C_out, T), lambda n, p: (n, 0, p)),
        ),
        compiler_params=pltpu.CompilerParams(**compiler_kwargs),
    )(x_pix, params["w1"], params["b1"], w2_bf16, params["b2"], w3_t,
      params["b3"])

    # Restore NCHW via a free reshape (no padding to drop).
    return out_pix.reshape(N, C_out, H, W)


def init_params(key, input_nc=3, output_nc=3, n_channel=32):
    """Deterministic synthetic init.  Weights are stored in PyTorch Conv2d
    orientation (C_out, C_in); biases as (C_out, 1) for lane broadcasting."""
    k1, k2, k3, k4, k5, k6 = jax.random.split(key, 6)
    s = 0.1
    return {
        "w1": s * jax.random.normal(k1, (n_channel, input_nc), jnp.float32),
        "b1": s * jax.random.normal(k2, (n_channel, 1), jnp.float32),
        "w2": s * jax.random.normal(k3, (n_channel, n_channel), jnp.float32),
        "b2": s * jax.random.normal(k4, (n_channel, 1), jnp.float32),
        "w3": s * jax.random.normal(k5, (output_nc, n_channel), jnp.float32),
        "b3": s * jax.random.normal(k6, (output_nc, 1), jnp.float32),
    }


def _reference_forward(x_nchw, params):
    """Plain-JAX reference with matching numerics: f32 (HIGHEST precision)
    for layers 1 & 3, bf16-operand / f32-accumulate for layer 2."""
    N, C, H, W = x_nchw.shape
    xp = x_nchw.reshape(N, C, H * W).astype(jnp.float32)
    hp = jax.lax.Precision.HIGHEST
    h = jnp.einsum("oc,ncp->nop", params["w1"], xp,
                   precision=hp) + params["b1"][None]
    h = jnp.maximum(h, 0.0)
    h = jnp.einsum("oc,ncp->nop", params["w2"].astype(jnp.bfloat16),
                   h.astype(jnp.bfloat16),
                   preferred_element_type=jnp.float32) + params["b2"][None]
    h = jnp.maximum(h, 0.0)
    o = jnp.einsum("oc,ncp->nop", params["w3"], h,
                   precision=hp) + params["b3"][None]
    return o.reshape(N, -1, H, W)


if __name__ == "__main__":
    key = jax.random.PRNGKey(0)
    kx, kp = jax.random.split(key)

    # Small shapes consistent with the module: N=2, C_in=3, H=W=16.
    x = jax.random.normal(kx, (2, 3, 16, 16), jnp.float32)
    params = init_params(kp, input_nc=3, output_nc=3, n_channel=32)

    fwd = jax.jit(functools.partial(stainnet_forward, tile_pixels=16384))
    out = jax.block_until_ready(fwd(x, params))

    ref = _reference_forward(x, params)
    assert out.shape == (2, 3, 16, 16)
    err = float(jnp.max(jnp.abs(out - ref)))
    assert jnp.allclose(out, ref, atol=1e-4, rtol=1e-4), err

    print("KERNEL_OK")
</pallas_src>

<mosaic_0001>
module attributes {stable_mosaic.version = 11 : i64} {
  func.func @_stainnet_kernel(%arg0: i32, %arg1: i32, %arg2: memref<1x3x256xf32, #tpu.memory_space<vmem>>, %arg3: memref<32x3xf32, #tpu.memory_space<vmem>>, %arg4: memref<32x1xf32, #tpu.memory_space<vmem>>, %arg5: memref<32x32xbf16, #tpu.memory_space<vmem>>, %arg6: memref<32x1xf32, #tpu.memory_space<vmem>>, %arg7: memref<32x3xf32, #tpu.memory_space<vmem>>, %arg8: memref<3x1xf32, #tpu.memory_space<vmem>>, %arg9: memref<1x3x256xf32, #tpu.memory_space<vmem>>) attributes {dimension_semantics = [#tpu.dimension_semantics<parallel>, #tpu.dimension_semantics<parallel>], iteration_bounds = array<i64: 2, 1>, scalar_prefetch = 0 : i64, scratch_operands = 0 : i64, tpu.core_type = #tpu.core_type<tc>, window_params = [{transform_indices = @transform_0, window_bounds = array<i64: 1, 3, 256>}, {pipeline_mode = #tpu.pipeline_mode<synchronous>, transform_indices = @transform_1, window_bounds = array<i64: 32, 3>}, {pipeline_mode = #tpu.pipeline_mode<synchronous>, transform_indices = @transform_2, window_bounds = array<i64: 32, 1>}, {pipeline_mode = #tpu.pipeline_mode<synchronous>, transform_indices = @transform_3, window_bounds = array<i64: 32, 32>}, {pipeline_mode = #tpu.pipeline_mode<synchronous>, transform_indices = @transform_4, window_bounds = array<i64: 32, 1>}, {pipeline_mode = #tpu.pipeline_mode<synchronous>, transform_indices = @transform_5, window_bounds = array<i64: 32, 3>}, {pipeline_mode = #tpu.pipeline_mode<synchronous>, transform_indices = @transform_6, window_bounds = array<i64: 3, 1>}, {transform_indices = @transform_7, window_bounds = array<i64: 1, 3, 256>}]} {
    %c0 = arith.constant 0 : index
    %c0_0 = arith.constant 0 : index
    %c0_1 = arith.constant 0 : index
    %0 = vector.load %arg2[%c0, %c0_0, %c0_1] : memref<1x3x256xf32, #tpu.memory_space<vmem>>, vector<1x3x256xf32>
    %1 = vector.shape_cast %0 : vector<1x3x256xf32> to vector<3x256xf32>
    %c0_2 = arith.constant 0 : index
    %c0_3 = arith.constant 0 : index
    %2 = vector.load %arg3[%c0_2, %c0_3] : memref<32x3xf32, #tpu.memory_space<vmem>>, vector<32x3xf32>
    %3 = vector.extract_strided_slice %2 {offsets = [0, 0], sizes = [32, 1], strides = [1, 1]} : vector<32x3xf32> to vector<32x1xf32>
    %4 = vector.extract_strided_slice %1 {offsets = [0, 0], sizes = [1, 256], strides = [1, 1]} : vector<3x256xf32> to vector<1x256xf32>
    %5 = vector.broadcast %3 : vector<32x1xf32> to vector<32x256xf32>
    %6 = vector.broadcast %4 : vector<1x256xf32> to vector<32x256xf32>
    %7 = arith.mulf %5, %6 : vector<32x256xf32>
    %8 = vector.extract_strided_slice %2 {offsets = [0, 1], sizes = [32, 1], strides = [1, 1]} : vector<32x3xf32> to vector<32x1xf32>
    %9 = vector.extract_strided_slice %1 {offsets = [1, 0], sizes = [1, 256], strides = [1, 1]} : vector<3x256xf32> to vector<1x256xf32>
    %10 = vector.broadcast %8 : vector<32x1xf32> to vector<32x256xf32>
    %11 = vector.broadcast %9 : vector<1x256xf32> to vector<32x256xf32>
    %12 = arith.mulf %10, %11 : vector<32x256xf32>
    %13 = arith.addf %7, %12 : vector<32x256xf32>
    %14 = vector.extract_strided_slice %2 {offsets = [0, 2], sizes = [32, 1], strides = [1, 1]} : vector<32x3xf32> to vector<32x1xf32>
    %15 = vector.extract_strided_slice %1 {offsets = [2, 0], sizes = [1, 256], strides = [1, 1]} : vector<3x256xf32> to vector<1x256xf32>
    %16 = vector.broadcast %14 : vector<32x1xf32> to vector<32x256xf32>
    %17 = vector.broadcast %15 : vector<1x256xf32> to vector<32x256xf32>
    %18 = arith.mulf %16, %17 : vector<32x256xf32>
    %19 = arith.addf %13, %18 : vector<32x256xf32>
    %c0_4 = arith.constant 0 : index
    %c0_5 = arith.constant 0 : index
    %20 = vector.load %arg4[%c0_4, %c0_5] : memref<32x1xf32, #tpu.memory_space<vmem>>, vector<32x1xf32>
    %21 = vector.broadcast %20 : vector<32x1xf32> to vector<32x256xf32>
    %22 = arith.addf %19, %21 : vector<32x256xf32>
    %cst = arith.constant 0.000000e+00 : f32
    %23 = vector.broadcast %cst : f32 to vector<32x256xf32>
    %24 = arith.maximumf %22, %23 : vector<32x256xf32>
    %c0_6 = arith.constant 0 : index
    %c0_7 = arith.constant 0 : index
    %25 = vector.load %arg5[%c0_6, %c0_7] : memref<32x32xbf16, #tpu.memory_space<vmem>>, vector<32x32xbf16>
    %26 = arith.truncf %24 : vector<32x256xf32> to vector<32x256xbf16>
    %cst_8 = arith.constant dense<0.000000e+00> : vector<32x256xf32>
    %27 = tpu.matmul %25, %26, %cst_8 {dimension_numbers = #tpu.dot_dimension_numbers<[1], [0], [0], [1], [0, 0, 1, 1], [], []>} : vector<32x32xbf16>, vector<32x256xbf16>, vector<32x256xf32> -> vector<32x256xf32>
    %c0_9 = arith.constant 0 : index
    %c0_10 = arith.constant 0 : index
    %28 = vector.load %arg6[%c0_9, %c0_10] : memref<32x1xf32, #tpu.memory_space<vmem>>, vector<32x1xf32>
    %29 = vector.broadcast %28 : vector<32x1xf32> to vector<32x256xf32>
    %30 = arith.addf %27, %29 : vector<32x256xf32>
    %cst_11 = arith.constant 0.000000e+00 : f32
    %31 = vector.broadcast %cst_11 : f32 to vector<32x256xf32>
    %32 = arith.maximumf %30, %31 : vector<32x256xf32>
    %c0_12 = arith.constant 0 : index
    %c0_13 = arith.constant 0 : index
    %33 = vector.load %arg7[%c0_12, %c0_13] : memref<32x3xf32, #tpu.memory_space<vmem>>, vector<32x3xf32>
    %34 = vector.extract_strided_slice %33 {offsets = [0, 0], sizes = [32, 1], strides = [1, 1]} : vector<32x3xf32> to vector<32x1xf32>
    %35 = vector.broadcast %34 : vector<32x1xf32> to vector<32x256xf32>
    %36 = arith.mulf %35, %32 : vector<32x256xf32>
    %cst_14 = arith.constant dense<0.000000e+00> : vector<256xf32>
    %37 = vector.multi_reduction <add>, %36, %cst_14 [0] : vector<32x256xf32> to vector<256xf32>
    %38 = vector.shape_cast %37 : vector<256xf32> to vector<1x256xf32>
    %39 = vector.extract_strided_slice %33 {offsets = [0, 1], sizes = [32, 1], strides = [1, 1]} : vector<32x3xf32> to vector<32x1xf32>
    %40 = vector.broadcast %39 : vector<32x1xf32> to vector<32x256xf32>
    %41 = arith.mulf %40, %32 : vector<32x256xf32>
    %cst_15 = arith.constant dense<0.000000e+00> : vector<256xf32>
    %42 = vector.multi_reduction <add>, %41, %cst_15 [0] : vector<32x256xf32> to vector<256xf32>
    %43 = vector.shape_cast %42 : vector<256xf32> to vector<1x256xf32>
    %44 = vector.extract_strided_slice %33 {offsets = [0, 2], sizes = [32, 1], strides = [1, 1]} : vector<32x3xf32> to vector<32x1xf32>
    %45 = vector.broadcast %44 : vector<32x1xf32> to vector<32x256xf32>
    %46 = arith.mulf %45, %32 : vector<32x256xf32>
    %cst_16 = arith.constant dense<0.000000e+00> : vector<256xf32>
    %47 = vector.multi_reduction <add>, %46, %cst_16 [0] : vector<32x256xf32> to vector<256xf32>
    %48 = vector.shape_cast %47 : vector<256xf32> to vector<1x256xf32>
    %49 = tpu.concatenate %38, %43, %48 in 0 : vector<1x256xf32>, vector<1x256xf32>, vector<1x256xf32> -> vector<3x256xf32>
    %c0_17 = arith.constant 0 : index
    %c0_18 = arith.constant 0 : index
    %50 = vector.load %arg8[%c0_17, %c0_18] : memref<3x1xf32, #tpu.memory_space<vmem>>, vector<3x1xf32>
    %51 = vector.broadcast %50 : vector<3x1xf32> to vector<3x256xf32>
    %52 = arith.addf %49, %51 : vector<3x256xf32>
    %c0_19 = arith.constant 0 : index
    %c0_20 = arith.constant 0 : index
    %c0_21 = arith.constant 0 : index
    %53 = vector.load %arg9[%c0_19, %c0_20, %c0_21] : memref<1x3x256xf32, #tpu.memory_space<vmem>>, vector<1x3x256xf32>
    %54 = vector.shape_cast %53 : vector<1x3x256xf32> to vector<3x256xf32>
    %55 = vector.shape_cast %52 : vector<3x256xf32> to vector<1x3x256xf32>
    tpu.vector_store %arg9[%c0_19, %c0_20, %c0_21], %55 {strides = array<i32>} : memref<1x3x256xf32, #tpu.memory_space<vmem>>, vector<1x3x256xf32>,
    return
  }
  func.func @transform_0(%arg0: i32, %arg1: i32) -> (i32, i32, i32) {
    %c0_i32 = arith.constant 0 : i32
    %c0_i32_0 = arith.constant 0 : i32
    return %arg0, %c0_i32, %arg1 : i32, i32, i32
  }
  func.func @transform_1(%arg0: i32, %arg1: i32) -> (i32, i32) {
    %c0_i32 = arith.constant 0 : i32
    %c0_i32_0 = arith.constant 0 : i32
    %c0_i32_1 = arith.constant 0 : i32
    return %c0_i32, %c0_i32_0 : i32, i32
  }
  func.func @transform_2(%arg0: i32, %arg1: i32) -> (i32, i32) {
    %c0_i32 = arith.constant 0 : i32
    %c0_i32_0 = arith.constant 0 : i32
    %c0_i32_1 = arith.constant 0 : i32
    return %c0_i32, %c0_i32_0 : i32, i32
  }
  func.func @transform_3(%arg0: i32, %arg1: i32) -> (i32, i32) {
    %c0_i32 = arith.constant 0 : i32
    %c0_i32_0 = arith.constant 0 : i32
    %c0_i32_1 = arith.constant 0 : i32
    return %c0_i32, %c0_i32_0 : i32, i32
  }
  func.func @transform_4(%arg0: i32, %arg1: i32) -> (i32, i32) {
    %c0_i32 = arith.constant 0 : i32
    %c0_i32_0 = arith.constant 0 : i32
    %c0_i32_1 = arith.constant 0 : i32
    return %c0_i32, %c0_i32_0 : i32, i32
  }
  func.func @transform_5(%arg0: i32, %arg1: i32) -> (i32, i32) {
    %c0_i32 = arith.constant 0 : i32
    %c0_i32_0 = arith.constant 0 : i32
    %c0_i32_1 = arith.constant 0 : i32
    return %c0_i32, %c0_i32_0 : i32, i32
  }
  func.func @transform_6(%arg0: i32, %arg1: i32) -> (i32, i32) {
    %c0_i32 = arith.constant 0 : i32
    %c0_i32_0 = arith.constant 0 : i32
    %c0_i32_1 = arith.constant 0 : i32
    return %c0_i32, %c0_i32_0 : i32, i32
  }
  func.func @transform_7(%arg0: i32, %arg1: i32) -> (i32, i32, i32) {
    %c0_i32 = arith.constant 0 : i32
    %c0_i32_0 = arith.constant 0 : i32
    return %arg0, %c0_i32, %arg1 : i32, i32, i32
  }
}

</mosaic_0001>

<bundles_post_ra>
// kernel: stainnet_forward.1
= control target key start
LH: loop header
LB: loop body
LE: loop exit
PB: predicated region body
PF: predicated region fallthrough
CT: control target
= control target key end

     0   :  { %s953_s24 = smov 0   ;;  %s955_s25 = smov 0   ;;  %s1064_s0 = inlined_call_operand.vmem [shape: f32[2,3,256], index: 0, kind: input, shape index: {}]   ;;  %s1065_s1 = inlined_call_operand.vmem [shape: f32[32,3], index: 1, kind: input, shape index: {}]   ;;  %s1066_s2 = inlined_call_operand.vmem [shape: f32[32,1], index: 2, kind: input, shape index: {}]   ;;  %s1067_s3 = inlined_call_operand.vmem [shape: bf16[32,32], index: 3, kind: input, shape index: {}]   ;;  %s1068_s4 = inlined_call_operand.vmem [shape: f32[32,1], index: 4, kind: input, shape index: {}]   ;;  %s1069_s5 = inlined_call_operand.vmem [shape: f32[32,3], index: 5, kind: input, shape index: {}]   ;;  %s1070_s6 = inlined_call_operand.vmem [shape: f32[3,1], index: 6, kind: input, shape index: {}]   ;;  %s1071_s7 = inlined_call_operand.vmem [shape: f32[2,3,256], index: 7, kind: output, shape index: {}]  }
   0x1   :  { %s957_s26 = smov 0  }
   0x2 LB: > { %s29_s27 = sadd.s32 1, %s904_s25  ;;  %p816_p0 = scmp.ge.s32.totalorder %s908_s26, 1  ;;  %s908_s26 = sphi %s957_s26, %s17_s26   ;;  %s904_s25 = sphi %s955_s25, %s1073_s25   ;;  %s900_s24 = sphi %s953_s24, %s1072_s24  }
   0x3   : > { %p31_p1 = scmp.ge.s32.totalorder %s29_s27, 2  ;;  %p258_p2 = scmp.lt.s32.totalorder %s908_s26, 3 }
   0x5   : > { %s1075_s27 = smov (%p31_p1, %s29_s27), 0  ;;  %p259_p3 = pnand %p816_p0, %p258_p2 }
   0x6   : > { %p299_p4 = scmp.lt.s32.totalorder (!%p259_p3), %s900_s24, 1 }
   0x7   : > { %262 = sbr.rel (%p259_p3) target bundleno = 350 (0x15e), region = 48 }
   0xc   : > { %v322_v0 = vld [vmem:[%s1065_s1 + $0x10] sm:$0xff]  ;;  %v321_v1 = vld [vmem:[%s1065_s1 + $0x8] sm:$0xff]  ;;  %v910_v2 = vmov 1   ;;  %v911_v3 = vmov 2   ;;  %v323_v4 = vld [vmem:[%s1065_s1 + $0x18] sm:$0xff]  ;;  %v912_v5 = vmov 0  }
   0xd   : > { %874 = vset.pattern.permute.xlu0 %v910_v2  ;;  %870 = vset.pattern.permute.xlu1 %v910_v2  ;;  %v320_v6 = vld [vmem:[%s1065_s1] sm:$0xff]  ;;  %v437_v8 = vld [vmem:[%s1066_s2 + $0x10] sm:$0xff]  ;;  %v438_v9 = vld [vmem:[%s1066_s2 + $0x18] sm:$0xff]  ;;  %s1077_s24 = smov (!%p299_p4, %s900_s24), 1  ;;  %vm517_vm0 = vcmask 261120   ;;  %vm704_vm1 = vcmask 1040384  }
   0xe   : > { %368 = vperm.xlu1 %870, %v322_v0   ;;  %364 = vperm.xlu0 %874, %v321_v1   ;;  %v435_v7 = vld [vmem:[%s1066_s2] sm:$0xff]  ;;  %v486_v10 = vld [vmem:[%s1068_s4 + $0x18] sm:$0xff]  ;;  %v436_v11 = vld [vmem:[%s1066_s2 + $0x8] sm:$0xff]  ;;  %s835_s14 = sshll.u32 %s1077_s24, 3  ;;  %vm707_vm2 = vcmask 1041408   ;;  %vm721_vm3 = vcmask 1043456  }
   0xf   : > { %871 = vset.pattern.permute.xlu2 %v911_v3  ;;  %v483_v12 = vld [vmem:[%s1068_s4] sm:$0xff]  ;;  %v484_v13 = vld [vmem:[%s1068_s4 + $0x8] sm:$0xff]  ;;  %v485_v15 = vld [vmem:[%s1068_s4 + $0x10] sm:$0xff]  ;;  %s306_s17 = scalar_lea.vmem %s1064_s0, %s835_s14  ;;  %s316_s11 = scalar_lea.vmem %s1071_s7, %s835_s14 }
  0x10   : > { %406 = vperm.xlu2 %871, %v322_v0   ;;  %v570_v14 = vld [vmem:[%s1069_s5] sm:$0xff]  ;;  %v571_v16 = vld [vmem:[%s1069_s5 + $0x8] sm:$0xff]  ;;  %v572_v39 = vld [vmem:[%s1069_s5 + $0x10] sm:$0xff] }
  0x11   : > { %v319_v24 = vld [vmem:[%s306_s17] sm:$0x77]  ;;  %v573_v54 = vld [vmem:[%s1069_s5 + $0x18] sm:$0xff] }
  0x12   : > { %v345_v25 = vperm.slane %v319_v24, 0  ;;  %v346_v26 = vperm.slane %v319_v24, 4  ;;  %v375_v28 = vperm.slane %v319_v24, 1  ;;  %v376_v29 = vperm.slane %v319_v24, 5 }
  0x13   : > { %v413_v31 = vperm.slane %v319_v24, 2  ;;  %v414_v32 = vperm.slane %v319_v24, 6  ;;  %v710_v24 = vld [vmem:[%s1070_s6] sm:$0x7] }
  0x14   : > { %v349_v33 = vperm.slane %v345_v25, 0  ;;  %v350_v34 = vperm.slane %v346_v26, 0  ;;  %v379_v35 = vperm.slane %v375_v28, 1  ;;  %v380_v36 = vperm.slane %v376_v29, 1 }
  0x15   : > { %v417_v41 = vperm.slane %v413_v31, 2  ;;  %v418_v42 = vperm.slane %v414_v32, 2 }
  0x16   : > { %372 = vperm.xlu1 %870, %v323_v4   ;;  %875 = vset.pattern.permute.xlu0 %v912_v5 }
  0x17   : > { %336 = vperm.xlu0 %875, %v322_v0  }
  0x18   : > { %410 = vperm.xlu2 %871, %v323_v4  }
  0x1e   : > { %872 = vset.pattern.permute.xlu1 %v912_v5 }
  0x1f   : > { %341 = vperm.xlu0 %875, %v323_v4   ;;  %331 = vperm.xlu1 %872, %v321_v1  }
  0x20   : > { %873 = vset.pattern.permute.xlu2 %v910_v2 }
  0x21   : > { %360 = vperm.xlu2 %873, %v320_v6  }
  0x27   : > { %876 = vset.pattern.permute.xlu1 %v911_v3  ;;  %326 = vperm.xlu0 %875, %v320_v6  }
  0x28   : > { %398 = vperm.xlu1 %876, %v320_v6  }
  0x29   : > { %877 = vset.pattern.permute.xlu2 %v911_v3 }
  0x2a   : > { %402 = vperm.xlu2 %877, %v321_v1  }
  0x2f   : > { %441 = vperm.xlu0 %875, %v435_v7  }
  0x30   : > { %878 = vset.pattern.permute.xlu1 %v912_v5 }
  0x31   : > { %451 = vperm.xlu1 %878, %v437_v8  }
  0x32   : > { %879 = vset.pattern.permute.xlu2 %v912_v5 }
  0x33   : > { %456 = vperm.xlu2 %879, %v438_v9  }
  0x37   : > { %504 = vperm.xlu0 %875, %v486_v10  }
  0x39   : > { %446 = vperm.xlu1 %878, %v436_v11  }
  0x3b   : > { %489 = vperm.xlu2 %879, %v483_v12  }
  0x3f   : > { %880 = vset.pattern.permute.xlu0 %v910_v2 }
  0x40   : > { %621 = vperm.xlu0 %880, %v570_v14  }
  0x41   : > { %494 = vperm.xlu1 %878, %v484_v13  }
  0x43   : > { %499 = vperm.xlu2 %879, %v485_v15  }
  0x48   : > { %629 = vperm.xlu0 %880, %v572_v39  }
  0x49   : > { %576 = vperm.xlu1 %878, %v570_v14  }
  0x4b   : > { %581 = vperm.xlu2 %879, %v571_v16  }
  0x50   : > { %633 = vperm.xlu0 %880, %v573_v54  }
  0x51   : > { %881 = vset.pattern.permute.xlu1 %v910_v2 }
  0x52   : > { %625 = vperm.xlu1 %881, %v571_v16  }
  0x53   : > { %882 = vset.pattern.permute.xlu2 %v911_v3 }
  0x54   : > { %663 = vperm.xlu2 %882, %v570_v14  }
  0x58   : > { %885 = vset.pattern.permute.xlu0 %v912_v5 }
  0x5a   : > { %883 = vset.pattern.permute.xlu1 %v911_v3 }
  0x5b   : > { %667 = vperm.xlu1 %883, %v571_v16  }
  0x5c   : > { %884 = vset.pattern.permute.xlu2 %v912_v5 }
  0x5d   : > { %586 = vperm.xlu2 %884, %v572_v39  }
  0x63   : > { %671 = vperm.xlu1 %883, %v572_v39  }
  0x65   : > { %591 = vperm.xlu2 %884, %v573_v54  }
  0x6a   : > { %v407_v17 = vpop.permute.xlu2 %406 }
  0x6b   : > { %675 = vperm.xlu1 %883, %v573_v54   ;;  %v423_v60 = vmul.f32 %v417_v41, %v407_v17  ;;  %v424_v61 = vmul.f32 %v418_v42, %v407_v17 }
  0x6d   : > { %713 = vperm.xlu2 %884, %v710_v24  }
  0x72   : > { %v411_v20 = vpop.permute.xlu2 %410 }
  0x73   : > { %v425_v50 = vmul.f32 %v417_v41, %v411_v20  ;;  %v426_v51 = vmul.f32 %v418_v42, %v411_v20 }
  0x7b   : > { %v361_v23 = vpop.permute.xlu2 %360 }
  0x7c   : > { %v381_v0 = vmul.f32 %v379_v35, %v361_v23  ;;  %v382_v1 = vmul.f32 %v380_v36, %v361_v23 }
  0x80   : > { %v369_v18 = vpop.permute.xlu1 %368  ;;  %v1020_v19 = vpop.permute.xlu0 %364 }
  0x81   : > { %v385_v52 = vmul.f32 %v379_v35, %v369_v18  ;;  %v386_v53 = vmul.f32 %v380_v36, %v369_v18  ;;  %v383_v10 = vmul.f32 %v379_v35, %v1020_v19  ;;  %v384_v11 = vmul.f32 %v380_v36, %v1020_v19 }
  0x84   : > { %v403_v40 = vpop.permute.xlu2 %402 }
  0x85   : > { %v421_v20 = vmul.f32 %v417_v41, %v403_v40 }
  0x88   : > { %v373_v21 = vpop.permute.xlu1 %372 }
  0x89   : > { %v337_v22 = vpop.permute.xlu0 %336  ;;  %v387_v43 = vmul.f32 %v379_v35, %v373_v21  ;;  %v388_v44 = vmul.f32 %v380_v36, %v373_v21  ;;  %v422_v21 = vmul.f32 %v418_v42, %v403_v40 }
  0x8a   : > { %v355_v45 = vmul.f32 %v349_v33, %v337_v22  ;;  %v356_v46 = vmul.f32 %v350_v34, %v337_v22 }
  0x8c   : > { %v393_v56 = vadd.f32 %v385_v52, %v355_v45  ;;  %v394_v57 = vadd.f32 %v386_v53, %v356_v46  ;;  %v837_v45 = vld [vmem:[%s1067_s3] sm:$0xff]  ;;  %v838_v46 = vld [vmem:[%s1067_s3 + $0x8] sm:$0xff] }
  0x8d   : > { %v457_v2 = vpop.permute.xlu2 %456 }
  0x8e   : > { %v431_v6 = vadd.f32 %v423_v60, %v393_v56  ;;  %v432_v7 = vadd.f32 %v424_v61, %v394_v57 }
  0x91   : > { %v332_v27 = vpop.permute.xlu1 %331  ;;  %v342_v30 = vpop.permute.xlu0 %341 }
  0x92   : > { %v357_v37 = vmul.f32 %v349_v33, %v342_v30  ;;  %v358_v38 = vmul.f32 %v350_v34, %v342_v30  ;;  %v353_v3 = vmul.f32 %v349_v33, %v332_v27  ;;  %v354_v4 = vmul.f32 %v350_v34, %v332_v27 }
  0x94   : > { %v395_v47 = vadd.f32 %v387_v43, %v357_v37  ;;  %v396_v48 = vadd.f32 %v388_v44, %v358_v38  ;;  %v391_v22 = vadd.f32 %v383_v10, %v353_v3  ;;  %v392_v23 = vadd.f32 %v384_v11, %v354_v4 }
  0x96   : > { %v433_v58 = vadd.f32 %v425_v50, %v395_v47  ;;  %v434_v59 = vadd.f32 %v426_v51, %v396_v48  ;;  %v430_v36 = vadd.f32 %v422_v21, %v392_v23  ;;  %v490_v47 = vpop.permute.xlu2 %489 }
  0x98   : > { %v465_v8 = vadd.f32 %v457_v2, %v433_v58  ;;  %v466_v9 = vadd.f32 %v457_v2, %v434_v59 }
  0x99   : > { %v327_v55 = vpop.permute.xlu0 %326 }
  0x9a   : > { %v399_v49 = vpop.permute.xlu1 %398  ;;  %v351_v62 = vmul.f32 %v349_v33, %v327_v55  ;;  %v352_v63 = vmul.f32 %v350_v34, %v327_v55  ;;  %v473_v27 = vmax.f32 %v465_v8, 0.0  ;;  %v474_v28 = vmax.f32 %v466_v9, 0.0 }
  0x9b   : > { %v419_v12 = vmul.f32 %v417_v41, %v399_v49  ;;  %v420_v13 = vmul.f32 %v418_v42, %v399_v49  ;;  %v429_v33 = vadd.f32 %v421_v20, %v391_v22 }
  0x9c   : > { %v389_v15 = vadd.f32 %v381_v0, %v351_v62  ;;  %v390_v16 = vadd.f32 %v382_v1, %v352_v63 }
  0x9e   : > { %v427_v29 = vadd.f32 %v419_v12, %v389_v15  ;;  %v428_v30 = vadd.f32 %v420_v13, %v390_v16  ;;  %v500_v49 = vpop.permute.xlu2 %499 }
  0xa1   : > { %v442_v19 = vpop.permute.xlu0 %441 }
  0xa2   : > { %v459_v34 = vadd.f32 %v442_v19, %v427_v29  ;;  %v460_v35 = vadd.f32 %v442_v19, %v428_v30 }
  0xa3   : > { %v452_v14 = vpop.permute.xlu1 %451 }
  0xa4   : > { %v463_v17 = vadd.f32 %v452_v14, %v431_v6  ;;  %v464_v18 = vadd.f32 %v452_v14, %v432_v7  ;;  %v467_v40 = vmax.f32 %v459_v34, 0.0  ;;  %v468_v41 = vmax.f32 %v460_v35, 0.0 }
  0xa6   : > { %v471_v25 = vmax.f32 %v463_v17, 0.0  ;;  %v472_v26 = vmax.f32 %v464_v18, 0.0  ;;  %v582_v51 = vpop.permute.xlu2 %581 }
  0xa8   : > { %v481_v31 = vpack.c.bf16 %v473_v27, %v471_v25  ;;  %v482_v32 = vpack.c.bf16 %v474_v28, %v472_v26 }
  0xa9   : > { %v505_v53 = vpop.permute.xlu0 %504 }
  0xaa   : > { %530 = vmatpush.bf16.msra.mxu0 %v481_v31  ;;  %839 = vmatpush.bf16.msra.mxu2 %v481_v31 }
  0xab   : > { %549 = vmatpush.bf16.msra.mxu1 %v482_v32  ;;  %841 = vmatpush.bf16.msra.mxu3 %v482_v32  ;;  %v447_v37 = vpop.permute.xlu1 %446 }
  0xac   : > { %v461_v38 = vadd.f32 %v447_v37, %v429_v33  ;;  %v462_v39 = vadd.f32 %v447_v37, %v430_v36 }
  0xae   : > { %v469_v42 = vmax.f32 %v461_v38, 0.0  ;;  %v470_v5 = vmax.f32 %v462_v39, 0.0  ;;  %v664_v54 = vpop.permute.xlu2 %663 }
  0xb0   : > { %v479_v43 = vpack.c.bf16 %v469_v42, %v467_v40  ;;  %v480_v44 = vpack.c.bf16 %v470_v5, %v468_v41 }
  0xb2   : > { %531 = vmatpush.bf16.msra.mxu0 %v479_v43  ;;  %840 = vmatpush.bf16.msra.mxu2 %v479_v43  ;;  %v622_v55 = vpop.permute.xlu0 %621 }
  0xb3   : > { %550 = vmatpush.bf16.msra.mxu1 %v480_v44  ;;  %842 = vmatpush.bf16.msra.mxu3 %v480_v44  ;;  %v495_v48 = vpop.permute.xlu1 %494 }
  0xb5   : > { %829 = vmatmul.msk.bf16.vlgmr.msra.gmra.mxu0 %vm517_vm0, %v837_v45  ;;  %830 = vmatmul.msk.bf16.vlgmr.msra.gmra.mxu2 %vm517_vm0, %v838_v46 }
  0xb6   : > { %831 = vmatmul.msk.bf16.vlgmr.msra.gmra.mxu1 %vm517_vm0, %v837_v45  ;;  %832 = vmatmul.msk.bf16.vlgmr.msra.gmra.mxu3 %vm517_vm0, %v838_v46 }
  0xb7   : > { %v587_v61 = vpop.permute.xlu2 %586 }
  0xba   : > { %v630_v0 = vpop.permute.xlu0 %629 }
  0xbb   : > { %v577_v50 = vpop.permute.xlu1 %576 }
  0xbf   : > { %v592_v45 = vpop.permute.xlu2 %591 }
  0xc2   : > { %v634_v41 = vpop.permute.xlu0 %633 }
  0xc4   : > { %v626_v52 = vpop.permute.xlu1 %625 }
  0xcd   : > { %v668_v56 = vpop.permute.xlu1 %667 }
  0xd5   : > { %v672_v4 = vpop.permute.xlu1 %671 }
  0xdd   : > { %v676_v46 = vpop.permute.xlu1 %675 }
 0x132   : > { %v533_v57 = vpop.f32.mrf.mxu0 }
 0x133   : > { %v552_v58 = vpop.f32.mrf.mxu1  ;;  %v534_v59 = vadd.f32 %v533_v57, %v490_v47 }
 0x134   : > { %v553_v60 = vadd.f32 %v552_v58, %v490_v47 }
 0x135   : > { %v562_v62 = vmax.f32 %v534_v59, 0.0 }
 0x136   : > { %v563_v1 = vmax.f32 %v553_v60, 0.0 }
 0x137   : > { %v594_v11 = vmul.f32 %v577_v50, %v562_v62  ;;  %v636_v12 = vmul.f32 %v622_v55, %v562_v62  ;;  %v678_v15 = vmul.f32 %v664_v54, %v562_v62 }
 0x138   : > { %v538_v63 = vpop.f32.mrf.mxu2  ;;  %v595_v16 = vmul.f32 %v577_v50, %v563_v1  ;;  %v637_v17 = vmul.f32 %v622_v55, %v563_v1  ;;  %v679_v20 = vmul.f32 %v664_v54, %v563_v1 }
 0x139   : > { %v539_v2 = vadd.f32 %v538_v63, %v500_v49  ;;  %v557_v3 = vpop.f32.mrf.mxu3 }
 0x13a   : > { %v558_v6 = vadd.f32 %v557_v3, %v500_v49  ;;  %v535_v7 = vpop.f32.mrf.mxu0 }
 0x13b   : > { %v566_v8 = vmax.f32 %v539_v2, 0.0  ;;  %v536_v9 = vadd.f32 %v535_v7, %v495_v48  ;;  %v554_v10 = vpop.f32.mrf.mxu1 }
 0x13c   : > { %v567_v13 = vmax.f32 %v558_v6, 0.0  ;;  %v555_v14 = vadd.f32 %v554_v10, %v495_v48 }
 0x13d   : > { %v564_v18 = vmax.f32 %v536_v9, 0.0  ;;  %v598_v21 = vmul.f32 %v587_v61, %v566_v8  ;;  %v640_v22 = vmul.f32 %v630_v0, %v566_v8  ;;  %v682_v24 = vmul.f32 %v672_v4, %v566_v8 }
 0x13e   : > { %v565_v23 = vmax.f32 %v555_v14, 0.0  ;;  %v599_v28 = vmul.f32 %v587_v61, %v567_v13  ;;  %v641_v42 = vmul.f32 %v630_v0, %v567_v13  ;;  %v683_v5 = vmul.f32 %v672_v4, %v567_v13 }
 0x13f   : > { %v596_v25 = vmul.f32 %v582_v51, %v564_v18  ;;  %v638_v26 = vmul.f32 %v626_v52, %v564_v18  ;;  %v680_v27 = vmul.f32 %v668_v56, %v564_v18 }
 0x140   : > { %v597_v19 = vmul.f32 %v582_v51, %v565_v23  ;;  %v639_v29 = vmul.f32 %v626_v52, %v565_v23  ;;  %v681_v30 = vmul.f32 %v668_v56, %v565_v23  ;;  %v540_v31 = vpop.f32.mrf.mxu2 }
 0x141   : > { %v602_v32 = vadd.f32 %v596_v25, %v594_v11  ;;  %v644_v33 = vadd.f32 %v638_v26, %v636_v12  ;;  %v686_v34 = vadd.f32 %v680_v27, %v678_v15  ;;  %v541_v35 = vadd.f32 %v540_v31, %v505_v53  ;;  %v559_v36 = vpop.f32.mrf.mxu3 }
 0x142   : > { %v611_v37 = vadd.f32 %v597_v19, %v595_v16  ;;  %v653_v38 = vadd.f32 %v639_v29, %v637_v17  ;;  %v695_v39 = vadd.f32 %v681_v30, %v679_v20  ;;  %v560_v40 = vadd.f32 %v559_v36, %v505_v53 }
 0x143   : > { %v568_v43 = vmax.f32 %v541_v35, 0.0  ;;  %v603_v44 = vadd.f32 %v602_v32, %v598_v21  ;;  %v645_v47 = vadd.f32 %v644_v33, %v640_v22  ;;  %v687_v48 = vadd.f32 %v686_v34, %v682_v24 }
 0x144   : > { %v569_v49 = vmax.f32 %v560_v40, 0.0  ;;  %v612_v50 = vadd.f32 %v611_v37, %v599_v28  ;;  %v654_v55 = vadd.f32 %v653_v38, %v641_v42  ;;  %v696_v59 = vadd.f32 %v695_v39, %v683_v5  ;;  %v714_v40 = vpop.permute.xlu2 %713 }
 0x145   : > { %v600_v51 = vmul.f32 %v592_v45, %v568_v43  ;;  %v642_v52 = vmul.f32 %v634_v41, %v568_v43  ;;  %v684_v54 = vmul.f32 %v676_v46, %v568_v43 }
 0x146   : > { %v601_v56 = vmul.f32 %v592_v45, %v569_v49  ;;  %v643_v57 = vmul.f32 %v634_v41, %v569_v49  ;;  %v685_v58 = vmul.f32 %v676_v46, %v569_v49 }
 0x147   : > { %v604_v53 = vadd.f32 %v603_v44, %v600_v51  ;;  %v646_v60 = vadd.f32 %v645_v47, %v642_v52  ;;  %v688_v61 = vadd.f32 %v687_v48, %v684_v54 }
 0x148   : > { %v613_v62 = vadd.f32 %v612_v50, %v601_v56  ;;  %v655_v63 = vadd.f32 %v654_v55, %v643_v57  ;;  %v697_v0 = vadd.f32 %v696_v59, %v685_v58 }
 0x149   : > { %v605_v1 = vrot.slane %v604_v53, 4  ;;  %v647_v2 = vrot.slane %v646_v60, 4  ;;  %v689_v3 = vrot.slane %v688_v61, 4 }
 0x14a   : > { %v614_v4 = vrot.slane %v613_v62, 4  ;;  %v656_v6 = vrot.slane %v655_v63, 4  ;;  %v698_v7 = vrot.slane %v697_v0, 4 }
 0x14b   : > { %v606_v8 = vadd.f32 %v605_v1, %v604_v53  ;;  %v648_v9 = vadd.f32 %v647_v2, %v646_v60  ;;  %v690_v10 = vadd.f32 %v689_v3, %v688_v61 }
 0x14c   : > { %v615_v11 = vadd.f32 %v614_v4, %v613_v62  ;;  %v657_v12 = vadd.f32 %v656_v6, %v655_v63  ;;  %v699_v13 = vadd.f32 %v698_v7, %v697_v0 }
 0x14d   : > { %v607_v14 = vrot.slane %v606_v8, 2  ;;  %v649_v15 = vrot.slane %v648_v9, 2  ;;  %v691_v16 = vrot.slane %v690_v10, 2 }
 0x14e   : > { %v616_v17 = vrot.slane %v615_v11, 2  ;;  %v658_v18 = vrot.slane %v657_v12, 2  ;;  %v700_v20 = vrot.slane %v699_v13, 2 }
 0x14f   : > { %v608_v21 = vadd.f32 %v607_v14, %v606_v8  ;;  %v650_v22 = vadd.f32 %v649_v15, %v648_v9  ;;  %v692_v23 = vadd.f32 %v691_v16, %v690_v10 }
 0x150   : > { %v617_v24 = vadd.f32 %v616_v17, %v615_v11  ;;  %v659_v25 = vadd.f32 %v658_v18, %v657_v12  ;;  %v701_v26 = vadd.f32 %v700_v20, %v699_v13 }
 0x151   : > { %v609_v27 = vrot.slane %v608_v21, 1  ;;  %v651_v28 = vrot.slane %v650_v22, 1  ;;  %v693_v19 = vrot.slane %v692_v23, 1 }
 0x152   : > { %v618_v29 = vrot.slane %v617_v24, 1  ;;  %v660_v30 = vrot.slane %v659_v25, 1  ;;  %v702_v31 = vrot.slane %v701_v26, 1 }
 0x153   : > { %v610_v32 = vadd.f32 %v609_v27, %v608_v21  ;;  %v652_v33 = vadd.f32 %v651_v28, %v650_v22  ;;  %v694_v34 = vadd.f32 %v693_v19, %v692_v23 }
 0x154   : > { %v619_v35 = vadd.f32 %v618_v29, %v617_v24  ;;  %v661_v36 = vadd.f32 %v660_v30, %v659_v25  ;;  %v703_v37 = vadd.f32 %v702_v31, %v701_v26 }
 0x155   : > { %v705_v38 = vsel %vm704_vm1, %v610_v32, %v652_v33 }
 0x156   : > { %v706_v39 = vsel %vm704_vm1, %v619_v35, %v661_v36  ;;  %v708_v41 = vsel %vm707_vm2, %v705_v38, %v694_v34 }
 0x157   : > { %v709_v42 = vsel %vm707_vm2, %v706_v39, %v703_v37  ;;  %v716_v43 = vadd.f32 %v714_v40, %v708_v41 }
 0x158   : > { %v717_v5 = vadd.f32 %v714_v40, %v709_v42 }
 0x15a   : > { %v720_v44 = vrot.slane %v717_v5, 4 }
 0x15c   : > { %v722_v45 = vsel %vm721_vm3, %v716_v43, %v720_v44 }
 0x15d   : > { %724 = vst [vmem:[%s316_s11] sm:$0x77] %v722_v45 }
 0x15e PF: > { %s17_s26 = sadd.s32 1, %s908_s26   ;;  %s1072_s24 = smov %s904_s25 }
 0x15f   : > { %p14_p5 = scmp.ge.s32.totalorder %s17_s26, 4   ;;  %s1073_s25 = smov %s1075_s27 }
 0x161   :  { %16 = sbr.rel (!%p14_p5) target bundleno = 2 (0x2), region = 78 }

</bundles_post_ra>
